<compile_context>
chip_gen: v5e
topology: v5e:2x2
jax: 0.10.0
libtpu: 0.0.40
codegen_flags: <defaults>
</compile_context>

<pallas_src>
import functools

import jax
import jax.numpy as jnp
from jax.experimental import pallas as pl
from jax.experimental.pallas import tpu as pltpu

HIDDEN = 64
_TILE_LADDER = (8192, 4096, 2048, 1024, 512, 256, 128)


def _mlp_kernel(x_ref, w1_ref, wh_ref, w5_ref, bh_ref, b5_ref, o_ref):
    """Fused forward for one batch tile: 4x (Linear + ReLU) + final Linear.

    Matmuls run on the MXU with f32 accumulation; the bias-add/ReLU chain
    stays in f32 on the VPU.  Activations are cast to the weight dtype
    (bf16 or f32) only immediately before each dot.
    """
    w_dtype = w1_ref.dtype

    # Layer 1: (tile_b, in) @ (in, 64) -> f32 (tile_b, 64)
    h = jnp.dot(x_ref[...], w1_ref[...], preferred_element_type=jnp.float32)
    h = jnp.maximum(h + bh_ref[0:1, :], 0.0)

    # Hidden layers 2..4: (tile_b, 64) @ (64, 64), weights stacked as (3,64,64).
    for i in range(3):
        h = jnp.dot(h.astype(w_dtype), wh_ref[i],
                    preferred_element_type=jnp.float32)
        h = jnp.maximum(h + bh_ref[i + 1:i + 2, :], 0.0)

    # Output layer: (tile_b, 64) @ (64, out), no ReLU.
    out = jnp.dot(h.astype(w_dtype), w5_ref[...],
                  preferred_element_type=jnp.float32) + b5_ref[...]
    o_ref[...] = out.astype(o_ref.dtype)


def _choose_tile_b(batch, in_size, out_size, x_bytes):
    """Sublane-aligned batch tile, as large as the VMEM budget allows while
    keeping >= 2 tiles for v7x's two TensorCores when the batch permits."""
    padded8 = ((batch + 7) // 8) * 8
    # Per-row VMEM estimate: double-buffered x + out tiles plus a generous
    # allowance for the f32 activation working set inside the kernel.
    per_row = (2 * in_size * x_bytes
               + 2 * out_size * 4
               + 8 * HIDDEN * 4)
    budget = 16 * 1024 * 1024
    max_rows = max(8, budget // per_row)
    for t in _TILE_LADDER:
        if t <= max_rows and padded8 >= 2 * t:
            return t
    if padded8 <= max_rows:
        return padded8  # small batch: single sublane-aligned tile
    return max(8, (max_rows // 8) * 8)


@functools.partial(jax.jit, static_argnames=("use_bf16",))
def feedfwd_forward(x, params, use_bf16=True):
    """x: (B, input_size) float32. params: dict of w{i} (in,out), b{i} (out,).

    use_bf16=True (default): bf16 inputs/weights, f32 accumulate/bias/ReLU.
    Activation re-quantization compounds over 5 layers (~1e-2 rel error).
    """
    batch, in_size = x.shape
    out_size = params["w5"].shape[1]

    w_dtype = jnp.bfloat16 if use_bf16 else jnp.float32
    x_bytes = 2 if use_bf16 else 4

    tile_b = _choose_tile_b(batch, in_size, out_size, x_bytes)
    n_tiles = pl.cdiv(batch, tile_b)  # ragged last tile handled by Pallas

    # Consolidated parameters (fewer kernel inputs -> less per-step overhead).
    x_in = x.astype(w_dtype)
    w1 = params["w1"].astype(w_dtype)                                    # (in, 64)
    wh = jnp.stack([params["w2"], params["w3"], params["w4"]]).astype(w_dtype)  # (3,64,64)
    w5 = params["w5"].astype(w_dtype)                                    # (64, out)
    bh = jnp.stack([params[f"b{i}"] for i in range(1, 5)]).astype(jnp.float32)  # (4, 64)
    b5 = params["b5"].reshape(1, -1).astype(jnp.float32)                 # (1, out)

    # Constant index maps -> parameters stay resident in VMEM across tiles.
    in_specs = [
        pl.BlockSpec((tile_b, in_size), lambda i: (i, 0)),
        pl.BlockSpec(w1.shape, lambda i: (0, 0)),
        pl.BlockSpec(wh.shape, lambda i: (0, 0, 0)),
        pl.BlockSpec(w5.shape, lambda i: (0, 0)),
        pl.BlockSpec(bh.shape, lambda i: (0, 0)),
        pl.BlockSpec(b5.shape, lambda i: (0, 0)),
    ]
    out_spec = pl.BlockSpec((tile_b, out_size), lambda i: (i, 0))

    # Advisory cost estimate for XLA's scheduler.
    flops = 2 * batch * (in_size * HIDDEN + 3 * HIDDEN * HIDDEN + HIDDEN * out_size)
    param_bytes = (w1.size + wh.size + w5.size) * x_bytes + (bh.size + b5.size) * 4
    bytes_accessed = batch * (in_size * x_bytes + out_size * 4) + param_bytes
    cost = pl.CostEstimate(flops=int(flops), transcendentals=0,
                           bytes_accessed=int(bytes_accessed))

    return pl.pallas_call(
        _mlp_kernel,
        out_shape=jax.ShapeDtypeStruct((batch, out_size), jnp.float32),
        grid=(n_tiles,),
        in_specs=in_specs,
        out_specs=out_spec,
        compiler_params=pltpu.CompilerParams(
            dimension_semantics=("parallel",),
            vmem_limit_bytes=32 * 1024 * 1024,
        ),
        cost_estimate=cost,
    )(x_in, w1, wh, w5, bh, b5)


def init_params(key, input_size, output_size):
    """Deterministic init matching nn.Linear's default U(-1/sqrt(fan_in), +)."""
    dims = [(input_size, HIDDEN), (HIDDEN, HIDDEN), (HIDDEN, HIDDEN),
            (HIDDEN, HIDDEN), (HIDDEN, output_size)]
    params = {}
    for i, (fan_in, fan_out) in enumerate(dims, start=1):
        key, kw, kb = jax.random.split(key, 3)
        bound = 1.0 / (fan_in ** 0.5)
        # Stored as (in, out) == PyTorch weight (out, in) transposed.
        params[f"w{i}"] = jax.random.uniform(
            kw, (fan_in, fan_out), jnp.float32, minval=-bound, maxval=bound)
        params[f"b{i}"] = jax.random.uniform(
            kb, (fan_out,), jnp.float32, minval=-bound, maxval=bound)
    return params


def reference_forward(x, params):
    h = x
    for i in range(1, 5):
        h = jnp.maximum(h @ params[f"w{i}"] + params[f"b{i}"], 0.0)
    return h @ params["w5"] + params["b5"]


if __name__ == "__main__":
    key = jax.random.PRNGKey(0)
    key, kx, kx2 = jax.random.split(key, 3)

    batch, input_size, output_size = 8, 32, 16
    x = jax.random.normal(kx, (batch, input_size), jnp.float32)
    params = init_params(key, input_size, output_size)
    ref = reference_forward(x, params)

    # --- small-batch (single tile), exact f32 path, strict tolerance ---
    out_f32 = jax.block_until_ready(feedfwd_forward(x, params, use_bf16=False))
    assert out_f32.shape == (batch, output_size)
    assert jnp.allclose(out_f32, ref, atol=1e-5, rtol=1e-5)

    # --- default bf16 path (f32 accumulate), looser tolerance ---
    out_bf16 = jax.block_until_ready(feedfwd_forward(x, params))
    assert jnp.allclose(out_bf16, ref, atol=1e-1, rtol=1e-1)

    # --- larger batch: multi-tile grid with a ragged last tile (no jnp.pad) ---
    big_batch = 1000  # tile_b=256 -> 4 grid steps, last tile covers 232 rows
    xb = jax.random.normal(kx2, (big_batch, input_size), jnp.float32)
    ref_b = reference_forward(xb, params)

    out_b = jax.block_until_ready(feedfwd_forward(xb, params, use_bf16=False))
    assert out_b.shape == (big_batch, output_size)
    assert jnp.allclose(out_b, ref_b, atol=1e-4, rtol=1e-4)

    out_b_bf16 = jax.block_until_ready(feedfwd_forward(xb, params))
    assert jnp.allclose(out_b_bf16, ref_b, atol=1e-1, rtol=1e-1)

    print("KERNEL_OK")
</pallas_src>

<mosaic_0001>
module attributes {stable_mosaic.version = 11 : i64} {
  func.func @_mlp_kernel(%arg0: i32, %arg1: memref<8x32xf32, #tpu.memory_space<vmem>>, %arg2: memref<32x64xf32, #tpu.memory_space<vmem>>, %arg3: memref<3x64x64xf32, #tpu.memory_space<vmem>>, %arg4: memref<64x16xf32, #tpu.memory_space<vmem>>, %arg5: memref<4x64xf32, #tpu.memory_space<vmem>>, %arg6: memref<1x16xf32, #tpu.memory_space<vmem>>, %arg7: memref<8x16xf32, #tpu.memory_space<vmem>>) attributes {dimension_semantics = [#tpu.dimension_semantics<parallel>], iteration_bounds = array<i64: 1>, scalar_prefetch = 0 : i64, scratch_operands = 0 : i64, tpu.core_type = #tpu.core_type<tc>, window_params = [{transform_indices = @transform_0, window_bounds = array<i64: 8, 32>}, {pipeline_mode = #tpu.pipeline_mode<synchronous>, transform_indices = @transform_1, window_bounds = array<i64: 32, 64>}, {pipeline_mode = #tpu.pipeline_mode<synchronous>, transform_indices = @transform_2, window_bounds = array<i64: 3, 64, 64>}, {pipeline_mode = #tpu.pipeline_mode<synchronous>, transform_indices = @transform_3, window_bounds = array<i64: 64, 16>}, {pipeline_mode = #tpu.pipeline_mode<synchronous>, transform_indices = @transform_4, window_bounds = array<i64: 4, 64>}, {pipeline_mode = #tpu.pipeline_mode<synchronous>, transform_indices = @transform_5, window_bounds = array<i64: 1, 16>}, {transform_indices = @transform_6, window_bounds = array<i64: 8, 16>}]} {
    %c0 = arith.constant 0 : index
    %c0_0 = arith.constant 0 : index
    %0 = vector.load %arg1[%c0, %c0_0] : memref<8x32xf32, #tpu.memory_space<vmem>>, vector<8x32xf32>
    %c0_1 = arith.constant 0 : index
    %c0_2 = arith.constant 0 : index
    %1 = vector.load %arg2[%c0_1, %c0_2] : memref<32x64xf32, #tpu.memory_space<vmem>>, vector<32x64xf32>
    %cst = arith.constant dense<0.000000e+00> : vector<8x64xf32>
    %2 = tpu.matmul %0, %1, %cst {dimension_numbers = #tpu.dot_dimension_numbers<[1], [0], [0], [1], [0, 0, 1, 1], [], []>} : vector<8x32xf32>, vector<32x64xf32>, vector<8x64xf32> -> vector<8x64xf32>
    %c0_3 = arith.constant 0 : index
    %c0_4 = arith.constant 0 : index
    %3 = vector.load %arg5[%c0_3, %c0_4] : memref<4x64xf32, #tpu.memory_space<vmem>>, vector<1x64xf32>
    %4 = vector.broadcast %3 : vector<1x64xf32> to vector<8x64xf32>
    %5 = arith.addf %2, %4 : vector<8x64xf32>
    %cst_5 = arith.constant 0.000000e+00 : f32
    %6 = vector.broadcast %cst_5 : f32 to vector<8x64xf32>
    %7 = arith.maximumf %5, %6 : vector<8x64xf32>
    %c0_6 = arith.constant 0 : index
    %c0_7 = arith.constant 0 : index
    %c0_8 = arith.constant 0 : index
    %8 = vector.load %arg3[%c0_6, %c0_7, %c0_8] : memref<3x64x64xf32, #tpu.memory_space<vmem>>, vector<1x64x64xf32>
    %9 = vector.shape_cast %8 : vector<1x64x64xf32> to vector<64x64xf32>
    %cst_9 = arith.constant dense<0.000000e+00> : vector<8x64xf32>
    %10 = tpu.matmul %7, %9, %cst_9 {dimension_numbers = #tpu.dot_dimension_numbers<[1], [0], [0], [1], [0, 0, 1, 1], [], []>} : vector<8x64xf32>, vector<64x64xf32>, vector<8x64xf32> -> vector<8x64xf32>
    %c1 = arith.constant 1 : index
    %c0_10 = arith.constant 0 : index
    %11 = vector.load %arg5[%c1, %c0_10] : memref<4x64xf32, #tpu.memory_space<vmem>>, vector<1x64xf32>
    %12 = vector.broadcast %11 : vector<1x64xf32> to vector<8x64xf32>
    %13 = arith.addf %10, %12 : vector<8x64xf32>
    %cst_11 = arith.constant 0.000000e+00 : f32
    %14 = vector.broadcast %cst_11 : f32 to vector<8x64xf32>
    %15 = arith.maximumf %13, %14 : vector<8x64xf32>
    %c1_12 = arith.constant 1 : index
    %c0_13 = arith.constant 0 : index
    %c0_14 = arith.constant 0 : index
    %16 = vector.load %arg3[%c1_12, %c0_13, %c0_14] : memref<3x64x64xf32, #tpu.memory_space<vmem>>, vector<1x64x64xf32>
    %17 = vector.shape_cast %16 : vector<1x64x64xf32> to vector<64x64xf32>
    %cst_15 = arith.constant dense<0.000000e+00> : vector<8x64xf32>
    %18 = tpu.matmul %15, %17, %cst_15 {dimension_numbers = #tpu.dot_dimension_numbers<[1], [0], [0], [1], [0, 0, 1, 1], [], []>} : vector<8x64xf32>, vector<64x64xf32>, vector<8x64xf32> -> vector<8x64xf32>
    %c2 = arith.constant 2 : index
    %c0_16 = arith.constant 0 : index
    %19 = vector.load %arg5[%c2, %c0_16] : memref<4x64xf32, #tpu.memory_space<vmem>>, vector<1x64xf32>
    %20 = vector.broadcast %19 : vector<1x64xf32> to vector<8x64xf32>
    %21 = arith.addf %18, %20 : vector<8x64xf32>
    %cst_17 = arith.constant 0.000000e+00 : f32
    %22 = vector.broadcast %cst_17 : f32 to vector<8x64xf32>
    %23 = arith.maximumf %21, %22 : vector<8x64xf32>
    %c2_18 = arith.constant 2 : index
    %c0_19 = arith.constant 0 : index
    %c0_20 = arith.constant 0 : index
    %24 = vector.load %arg3[%c2_18, %c0_19, %c0_20] : memref<3x64x64xf32, #tpu.memory_space<vmem>>, vector<1x64x64xf32>
    %25 = vector.shape_cast %24 : vector<1x64x64xf32> to vector<64x64xf32>
    %cst_21 = arith.constant dense<0.000000e+00> : vector<8x64xf32>
    %26 = tpu.matmul %23, %25, %cst_21 {dimension_numbers = #tpu.dot_dimension_numbers<[1], [0], [0], [1], [0, 0, 1, 1], [], []>} : vector<8x64xf32>, vector<64x64xf32>, vector<8x64xf32> -> vector<8x64xf32>
    %c3 = arith.constant 3 : index
    %c0_22 = arith.constant 0 : index
    %27 = vector.load %arg5[%c3, %c0_22] : memref<4x64xf32, #tpu.memory_space<vmem>>, vector<1x64xf32>
    %28 = vector.broadcast %27 : vector<1x64xf32> to vector<8x64xf32>
    %29 = arith.addf %26, %28 : vector<8x64xf32>
    %cst_23 = arith.constant 0.000000e+00 : f32
    %30 = vector.broadcast %cst_23 : f32 to vector<8x64xf32>
    %31 = arith.maximumf %29, %30 : vector<8x64xf32>
    %c0_24 = arith.constant 0 : index
    %c0_25 = arith.constant 0 : index
    %32 = vector.load %arg4[%c0_24, %c0_25] : memref<64x16xf32, #tpu.memory_space<vmem>>, vector<64x16xf32>
    %cst_26 = arith.constant dense<0.000000e+00> : vector<8x16xf32>
    %33 = tpu.matmul %31, %32, %cst_26 {dimension_numbers = #tpu.dot_dimension_numbers<[1], [0], [0], [1], [0, 0, 1, 1], [], []>} : vector<8x64xf32>, vector<64x16xf32>, vector<8x16xf32> -> vector<8x16xf32>
    %c0_27 = arith.constant 0 : index
    %c0_28 = arith.constant 0 : index
    %34 = vector.load %arg6[%c0_27, %c0_28] : memref<1x16xf32, #tpu.memory_space<vmem>>, vector<1x16xf32>
    %35 = vector.broadcast %34 : vector<1x16xf32> to vector<8x16xf32>
    %36 = arith.addf %33, %35 : vector<8x16xf32>
    %c0_29 = arith.constant 0 : index
    %c0_30 = arith.constant 0 : index
    %37 = vector.load %arg7[%c0_29, %c0_30] : memref<8x16xf32, #tpu.memory_space<vmem>>, vector<8x16xf32>
    tpu.vector_store %arg7[%c0_29, %c0_30], %36 {strides = array<i32>} : memref<8x16xf32, #tpu.memory_space<vmem>>, vector<8x16xf32>,
    return
  }
  func.func @transform_0(%arg0: i32) -> (i32, i32) {
    %c0_i32 = arith.constant 0 : i32
    %c0_i32_0 = arith.constant 0 : i32
    return %arg0, %c0_i32 : i32, i32
  }
  func.func @transform_1(%arg0: i32) -> (i32, i32) {
    %c0_i32 = arith.constant 0 : i32
    %c0_i32_0 = arith.constant 0 : i32
    %c0_i32_1 = arith.constant 0 : i32
    return %c0_i32, %c0_i32_0 : i32, i32
  }
  func.func @transform_2(%arg0: i32) -> (i32, i32, i32) {
    %c0_i32 = arith.constant 0 : i32
    %c0_i32_0 = arith.constant 0 : i32
    %c0_i32_1 = arith.constant 0 : i32
    %c0_i32_2 = arith.constant 0 : i32
    return %c0_i32, %c0_i32_0, %c0_i32_1 : i32, i32, i32
  }
  func.func @transform_3(%arg0: i32) -> (i32, i32) {
    %c0_i32 = arith.constant 0 : i32
    %c0_i32_0 = arith.constant 0 : i32
    %c0_i32_1 = arith.constant 0 : i32
    return %c0_i32, %c0_i32_0 : i32, i32
  }
  func.func @transform_4(%arg0: i32) -> (i32, i32) {
    %c0_i32 = arith.constant 0 : i32
    %c0_i32_0 = arith.constant 0 : i32
    %c0_i32_1 = arith.constant 0 : i32
    return %c0_i32, %c0_i32_0 : i32, i32
  }
  func.func @transform_5(%arg0: i32) -> (i32, i32) {
    %c0_i32 = arith.constant 0 : i32
    %c0_i32_0 = arith.constant 0 : i32
    %c0_i32_1 = arith.constant 0 : i32
    return %c0_i32, %c0_i32_0 : i32, i32
  }
  func.func @transform_6(%arg0: i32) -> (i32, i32) {
    %c0_i32 = arith.constant 0 : i32
    %c0_i32_0 = arith.constant 0 : i32
    return %arg0, %c0_i32 : i32, i32
  }
}

</mosaic_0001>

<bundles_post_ra>
// kernel: feedfwd_forward.1
= control target key start
LH: loop header
LB: loop body
LE: loop exit
PB: predicated region body
PF: predicated region fallthrough
CT: control target
= control target key end

     0   :  { %vm31_vm0 = vcmask 261120   ;;  %s436_s0 = inlined_call_operand.vmem [shape: f32[8,32], index: 0, kind: input, shape index: {}]   ;;  %s437_s1 = inlined_call_operand.vmem [shape: f32[32,64], index: 1, kind: input, shape index: {}]   ;;  %s438_s2 = inlined_call_operand.vmem [shape: f32[3,64,64], index: 2, kind: input, shape index: {}]   ;;  %s439_s3 = inlined_call_operand.vmem [shape: f32[64,16], index: 3, kind: input, shape index: {}]   ;;  %s440_s4 = inlined_call_operand.vmem [shape: f32[4,64], index: 4, kind: input, shape index: {}]   ;;  %s441_s5 = inlined_call_operand.vmem [shape: f32[1,16], index: 5, kind: input, shape index: {}]   ;;  %s442_s6 = inlined_call_operand.hbm [shape: f32[8,16], index: 6, kind: output, shape index: {}]  }
   0x1   :  { %v28_v0 = vld [vmem:[%s437_s1 + $0x18] sm:$0xff]  ;;  %v27_v1 = vld [vmem:[%s437_s1 + $0x10] sm:$0xff]  ;;  %v26_v3 = vld [vmem:[%s437_s1 + $0x8] sm:$0xff] }
   0x2   :  { %47 = vmatpush.msra.mxu0 %v28_v0  ;;  %v63_v2 = vld [vmem:[%s438_s2 + $0x38] sm:$0xff]  ;;  %v25_v4 = vld [vmem:[%s437_s1] sm:$0xff]  ;;  %v62_v5 = vld [vmem:[%s438_s2 + $0x30] sm:$0xff] }
   0x3   :  { %78 = vmatpush.msra.mxu1 %v63_v2  ;;  %v24_v6 = vld [vmem:[%s436_s0] sm:$0xff]  ;;  %v61_v7 = vld [vmem:[%s438_s2 + $0x28] sm:$0xff] }
   0x4   :  { %48 = vmatpush.msra.mxu0 %v27_v1  ;;  %v60_v8 = vld [vmem:[%s438_s2 + $0x20] sm:$0xff] }
   0x5   :  { %79 = vmatpush.msra.mxu1 %v62_v5 }
   0x6   :  { %49 = vmatpush.msra.mxu0 %v26_v3 }
   0x7   :  { %11 = vsyncpa [#allocation3], 0  ;;  %80 = vmatpush.msra.mxu1 %v61_v7  ;;  %v59_v9 = vld [vmem:[%s438_s2 + $0x18] sm:$0xff]  ;;  %v58_v10 = vld [vmem:[%s438_s2 + $0x10] sm:$0xff]  ;;  %vm66_vm1 = vcmask 523264   ;;  %s267_s26 = smov [#allocation2]  }
   0x8   :  { %50 = vmatpush.msra.mxu0 %v25_v4  ;;  %v57_v11 = vld [vmem:[%s438_s2 + $0x8] sm:$0xff]  ;;  %v56_v12 = vld [vmem:[%s438_s2] sm:$0xff]  ;;  %v223_v13 = vld [vmem:[%s438_s2 + $0x78] sm:$0xff]  ;;  %s203_s27 = sshll.u32 %s267_s26, 4  ;;  %vm196_vm2 = vcmask 130048   ;;  %s204_s27 = int_to_ptr.vmem [resolvable:$true] %s203_s27 }
   0x9   :  { %214 = vmatmul.msk.f32.vlgmr.msra.gmra.mxu0 %vm31_vm0, %v24_v6  ;;  %81 = vmatpush.msra.mxu1 %v60_v8  ;;  %v222_v14 = vld [vmem:[%s438_s2 + $0x70] sm:$0xff]  ;;  %v221_v15 = vld [vmem:[%s438_s2 + $0x68] sm:$0xff]  ;;  %v220_v16 = vld [vmem:[%s438_s2 + $0x60] sm:$0xff] }
   0xa   :  { %113 = vmatpush.msra.mxu2 %v223_v13  ;;  %v219_v17 = vld [vmem:[%s438_s2 + $0x58] sm:$0xff]  ;;  %v236_v18 = vld [vmem:[%s440_s4] ss:$0 sm:$0xff]  ;;  %v218_v22 = vld [vmem:[%s438_s2 + $0x50] sm:$0xff] }
   0xb   :  { %82 = vmatpush.msra.mxu1 %v59_v9  ;;  %v217_v23 = vld [vmem:[%s438_s2 + $0x48] sm:$0xff]  ;;  %v216_v24 = vld [vmem:[%s438_s2 + $0x40] sm:$0xff]  ;;  %v232_v25 = vld [vmem:[%s438_s2 + $0xb8] sm:$0xff] }
   0xc   :  { %114 = vmatpush.msra.mxu2 %v222_v14  ;;  %v231_v26 = vld [vmem:[%s438_s2 + $0xb0] sm:$0xff]  ;;  %148 = vmatpush.msra.mxu3 %v232_v25  ;;  %v230_v27 = vld [vmem:[%s438_s2 + $0xa8] sm:$0xff]  ;;  %v229_v28 = vld [vmem:[%s438_s2 + $0xa0] sm:$0xff] }
   0xd   :  { %83 = vmatpush.msra.mxu1 %v58_v10  ;;  %v228_v29 = vld [vmem:[%s438_s2 + $0x98] sm:$0xff]  ;;  %v237_v30 = vld [vmem:[%s440_s4 + $0x1] ss:$0 sm:$0xff]  ;;  %v227_v34 = vld [vmem:[%s438_s2 + $0x90] sm:$0xff] }
   0xe   :  { %115 = vmatpush.msra.mxu2 %v221_v15  ;;  %149 = vmatpush.msra.mxu3 %v231_v26  ;;  %v226_v35 = vld [vmem:[%s438_s2 + $0x88] sm:$0xff]  ;;  %v225_v36 = vld [vmem:[%s438_s2 + $0x80] sm:$0xff]  ;;  %v168_v37 = vld [vmem:[%s439_s3 + $0x38] sm:$0xff] }
   0xf   :  { %84 = vmatpush.msra.mxu1 %v57_v11  ;;  %v167_v38 = vld [vmem:[%s439_s3 + $0x30] sm:$0xff]  ;;  %184 = vmatpush.msrb.mxu0 %v168_v37  ;;  %v166_v39 = vld [vmem:[%s439_s3 + $0x28] sm:$0xff]  ;;  %v165_v40 = vld [vmem:[%s439_s3 + $0x20] sm:$0xff] }
  0x10   :  { %116 = vmatpush.msra.mxu2 %v220_v16  ;;  %150 = vmatpush.msra.mxu3 %v230_v27  ;;  %v164_v41 = vld [vmem:[%s439_s3 + $0x18] sm:$0xff]  ;;  %v238_v42 = vld [vmem:[%s440_s4 + $0x2] ss:$0 sm:$0xff]  ;;  %v163_v46 = vld [vmem:[%s439_s3 + $0x10] sm:$0xff] }
  0x11   :  { %85 = vmatpush.msra.mxu1 %v56_v12  ;;  %185 = vmatpush.msrb.mxu0 %v167_v38  ;;  %v162_v47 = vld [vmem:[%s439_s3 + $0x8] sm:$0xff]  ;;  %v161_v48 = vld [vmem:[%s439_s3] sm:$0xff]  ;;  %s205_s3 = sshll.u32 %s442_s6, 4  ;;  %s206_s3 = int_to_ptr.hbm [resolvable:$true] %s205_s3 }
  0x12   :  { %117 = vmatpush.msra.mxu2 %v219_v17  ;;  %151 = vmatpush.msra.mxu3 %v229_v28  ;;  %v239_v49 = vld [vmem:[%s440_s4 + $0x3] ss:$0 sm:$0xff]  ;;  %v240_v53 = vld [vmem:[%s441_s5] ss:$0 sm:$0xff] }
  0x13   :  { %186 = vmatpush.msrb.mxu0 %v166_v39 }
  0x14   :  { %118 = vmatpush.msra.mxu2 %v218_v22  ;;  %152 = vmatpush.msra.mxu3 %v228_v29 }
  0x15   :  { %187 = vmatpush.msrb.mxu0 %v165_v40 }
  0x16   :  { %119 = vmatpush.msra.mxu2 %v217_v23  ;;  %153 = vmatpush.msra.mxu3 %v227_v34 }
  0x17   :  { %188 = vmatpush.msrb.mxu0 %v164_v41 }
  0x18   :  { %120 = vmatpush.msra.mxu2 %v216_v24  ;;  %154 = vmatpush.msra.mxu3 %v226_v35 }
  0x19   :  { %189 = vmatpush.msrb.mxu0 %v163_v46 }
  0x1a   :  { %155 = vmatpush.msra.mxu3 %v225_v36 }
  0x1b   :  { %190 = vmatpush.msrb.mxu0 %v162_v47 }
  0x1d   :  { %191 = vmatpush.msrb.mxu0 %v161_v48 }
  0x86   :  { %v52_v19 = vpop.f32.mrf.mxu0 }
  0x87   :  { %v53_v20 = vadd.f32 %v236_v18, %v52_v19 }
  0x89   :  { %v55_v21 = vmax.f32 %v53_v20, 0.0 }
  0x8b   :  { %215 = vmatmul.msk.f32.vlgmr.msra.gmra.mxu1 %vm66_vm1, %v55_v21 }
 0x108   :  { %v87_v31 = vpop.f32.mrf.mxu1 }
 0x109   :  { %v88_v32 = vadd.f32 %v237_v30, %v87_v31 }
 0x10b   :  { %v90_v33 = vmax.f32 %v88_v32, 0.0 }
 0x10d   :  { %224 = vmatmul.msk.f32.vlgmr.msra.gmra.mxu2 %vm66_vm1, %v90_v33 }
 0x190   :  { %v122_v43 = vpop.f32.mrf.mxu2 }
 0x191   :  { %v123_v44 = vadd.f32 %v238_v42, %v122_v43 }
 0x193   :  { %v125_v45 = vmax.f32 %v123_v44, 0.0 }
 0x195   :  { %233 = vmatmul.msk.f32.vlgmr.msra.gmra.mxu3 %vm66_vm1, %v125_v45 }
 0x218   :  { %v157_v50 = vpop.f32.mrf.mxu3 }
 0x219   :  { %v158_v51 = vadd.f32 %v239_v49, %v157_v50 }
 0x21b   :  { %v160_v52 = vmax.f32 %v158_v51, 0.0 }
 0x21d   :  { %234 = vmatmul.msk.f32.vlgmr.msrb.gmra.mxu0 %vm66_vm1, %v160_v52 }
 0x29a   :  { %v193_v54 = vpop.f32.mrf.mxu0 }
 0x29b   :  { %v194_v55 = vadd.f32 %v240_v53, %v193_v54 }
 0x29d   :  { %197 = vst.msk [vmem:[#allocation2] sm:$0xff] %vm196_vm2, %v194_v55 }
 0x29e   :  { %208 = dma.vmem_to_hbm [thread:$0]  %s204_s27, 128, %s206_s3, [#allocation3]  }
 0x29f   :  { %265 = dma.done.wait [#allocation3], 128  }
 0x2a0   :  { %266 = vsyncadd [#allocation3], 4294967168 }
 0x2a1   :  { %213 = vsyncpa [#allocation3], 1 }

</bundles_post_ra>
